<compile_context>
chip_gen: v7x
topology: tpu7x:2x2x1
jax: 0.10.0
libtpu: 0.0.40
codegen_flags: <defaults>
</compile_context>

<pallas_src>
import functools

import jax
import jax.numpy as jnp
from jax.experimental import pallas as pl
from jax.experimental.pallas import tpu as pltpu


# ------------------------------- Pallas kernel --------------------------------
def identity_dummy_kernel(x_ref, dummy_ref, o_ref):
    # dummy_ref: (1,) f32 scalar in SMEM; x_ref / o_ref: lane-dense VMEM tiles.
    d = dummy_ref[0]
    o_ref[...] = ((x_ref[...] + d) - d).astype(o_ref.dtype)


# ------------------------------ tiling heuristic -------------------------------
def _choose_row_tile(rows, cols, itemsize):
    """Pick a row tile for the gridded path, or None for the grid-free path."""
    if cols % 128 != 0:
        return None  # not lane-dense enough to bother tiling; run whole-slab
    tile = None
    for cand in (1024, 512, 256):
        if rows >= 2 * cand and rows % cand == 0:
            tile = cand
            break
    if tile is None:
        return None
    # Keep a single tile <= ~8 MiB so double-buffered input+output tiles
    # (~4x tile bytes live) stay inside v7x's 32 MiB default scoped VMEM.
    while tile > 8 and tile * cols * itemsize > (8 << 20):
        tile //= 2
    return tile


# --------------------------------- wrapper -------------------------------------
@functools.partial(jax.jit, donate_argnums=(0,))
def i_forward(x, dummy):
    orig_shape = x.shape
    cols = orig_shape[-1]
    x2d = x.reshape(-1, cols)                      # lane-dense (rows, H) slab
    rows = x2d.shape[0]
    out_shape = jax.ShapeDtypeStruct(x2d.shape, x2d.dtype)

    row_tile = _choose_row_tile(rows, cols, x2d.dtype.itemsize)

    if row_tile is None:
        # Grid-free: whole slab resident in VMEM, scalar param in SMEM.
        out2d = pl.pallas_call(
            identity_dummy_kernel,
            out_shape=out_shape,
            in_specs=[
                pl.BlockSpec(memory_space=pltpu.MemorySpace.VMEM),  # x (full slab)
                pl.BlockSpec(memory_space=pltpu.MemorySpace.SMEM),  # dummy scalar
            ],
            out_specs=pl.BlockSpec(memory_space=pltpu.MemorySpace.VMEM),
            input_output_aliases={0: 0},
        )(x2d, dummy)
    else:
        # 1-D grid over row tiles; "parallel" lets v7x shard rows over both TCs.
        grid = (rows // row_tile,)
        out2d = pl.pallas_call(
            identity_dummy_kernel,
            out_shape=out_shape,
            grid=grid,
            in_specs=[
                pl.BlockSpec((row_tile, cols), lambda i: (i, 0)),
                pl.BlockSpec(memory_space=pltpu.MemorySpace.SMEM),
            ],
            out_specs=pl.BlockSpec((row_tile, cols), lambda i: (i, 0)),
            input_output_aliases={0: 0},
            compiler_params=pltpu.CompilerParams(
                dimension_semantics=("parallel",)),
        )(x2d, dummy)

    return out2d.reshape(orig_shape)


# ----------------------------- pure-JAX reference ------------------------------
def reference_forward(x, dummy):
    d = dummy[0]
    return ((x + d) - d).astype(x.dtype)


# ----------------------------------- main ---------------------------------------
if __name__ == "__main__":
    key = jax.random.PRNGKey(0)
    k1, k2 = jax.random.split(key)

    dummy = jnp.ones((1,), dtype=jnp.float32)   # nn.Parameter(torch.ones(1))

    # --- small hidden-state-like shape (grid-free path) ---
    B, S, H = 2, 8, 128
    x = jax.random.normal(k1, (B, S, H), dtype=jnp.float32)
    ref = jax.block_until_ready(reference_forward(x, dummy))
    out = jax.block_until_ready(i_forward(x, dummy))          # x donated here
    assert out.shape == (B, S, H)
    assert out.dtype == jnp.float32
    assert bool(jnp.all(jnp.isfinite(out)))
    if not jnp.allclose(out, ref, rtol=1e-6, atol=1e-6):
        raise AssertionError("grid-free path: Pallas output does not match reference")

    # --- larger lane-dense slab to exercise the tiled (gridded, bf16) path ---
    R2, H2 = 1024, 256
    x2 = jax.random.normal(k2, (R2, H2), dtype=jnp.float32).astype(jnp.bfloat16)
    ref2 = jax.block_until_ready(reference_forward(x2, dummy))
    out2 = jax.block_until_ready(i_forward(x2, dummy))        # x2 donated here
    assert out2.shape == (R2, H2)
    assert out2.dtype == jnp.bfloat16
    if not jnp.allclose(out2.astype(jnp.float32), ref2.astype(jnp.float32),
                        rtol=1e-2, atol=1e-2):
        raise AssertionError("tiled path: Pallas output does not match reference")

    print("KERNEL_OK")
</pallas_src>

<mosaic_0001>
module attributes {stable_mosaic.version = 11 : i64} {
  func.func @identity_dummy_kernel(%arg0: memref<16x128xf32, #tpu.memory_space<vmem>>, %arg1: memref<1xf32, #tpu.memory_space<smem>>, %arg2: memref<16x128xf32, #tpu.memory_space<vmem>>) attributes {dimension_semantics = [], scalar_prefetch = 0 : i64, scratch_operands = 0 : i64, tpu.core_type = #tpu.core_type<tc>} {
    %c0 = arith.constant 0 : index
    %0 = memref.load %arg1[%c0] : memref<1xf32, #tpu.memory_space<smem>>
    %c0_0 = arith.constant 0 : index
    %c0_1 = arith.constant 0 : index
    %1 = vector.load %arg0[%c0_0, %c0_1] : memref<16x128xf32, #tpu.memory_space<vmem>>, vector<16x128xf32>
    %2 = vector.broadcast %0 : f32 to vector<16x128xf32>
    %3 = arith.addf %1, %2 : vector<16x128xf32>
    %4 = vector.broadcast %0 : f32 to vector<16x128xf32>
    %5 = arith.subf %3, %4 : vector<16x128xf32>
    %c0_2 = arith.constant 0 : index
    %c0_3 = arith.constant 0 : index
    %6 = vector.load %arg2[%c0_2, %c0_3] : memref<16x128xf32, #tpu.memory_space<vmem>>, vector<16x128xf32>
    tpu.vector_store %arg2[%c0_2, %c0_3], %5 {strides = array<i32>} : memref<16x128xf32, #tpu.memory_space<vmem>>, vector<16x128xf32>,
    return
  }
}

</mosaic_0001>

<bundles_post_ra>
// kernel: i_forward.1
= control target key start
LH: loop header
LB: loop body
LE: loop exit
PB: predicated region body
PF: predicated region fallthrough
CT: control target
= control target key end

     0   :  { %8 = vsyncpa [#allocation4], 0  ;;  %s158_s0 = inlined_call_operand.hbm [shape: f32[16,128], index: 0, kind: input, shape index: {}, may-alias: {0,2}]   ;;  %s159_s1 = inlined_call_operand.<no memory space> [shape: f32[1], index: 1, kind: input, shape index: {}]   ;;  %s160_s2 = inlined_call_operand.hbm [shape: f32[16,128], index: 2, kind: output, shape index: {}, may-alias: {0,2}]  }
   0x1   :  { %9 = vsyncpa [#allocation5], 0  ;;  %s106_s9 = smov [#allocation3]   ;;  %s58_s13 = scalar_lea.hbm %s158_s0, 256 }
   0x2   :  { %s15_s10 = sshll.u32 %s106_s9, 4  ;;  %p59_p0 = scmp.ne.s32.totalorder %s158_s0, %s58_s13  ;;  %s16_s10 = int_to_ptr.vmem [resolvable:$true] %s15_s10 }
   0x3   :  { %p62_p1 = scmp.lt.u32.totalorder %s58_s13, %s158_s0 }
   0x5   :  { %p64_p2 = pnand %p62_p1, %p59_p0 }
   0x7   :  { %67 = shalt.err (!%p64_p2)
}
   0x8   :  { %s68_s18 = scalar_lea.vmem %s16_s10, 256  ;;  %p73_p4 = scmp.lt.s32.totalorder %s16_s10, %s16_s10 }
   0x9   :  { %p69_p3 = scmp.ne.s32.totalorder %s16_s10, %s68_s18  ;;  %p74_p5 = scmp.lt.s32.totalorder %s68_s18, %s68_s18 }
   0xb   :  { %p75_p6 = por %p74_p5, %p73_p4 }
   0xd   :  { %p76_p7 = pnand %p75_p6, %p69_p3 }
   0xf   :  { %79 = shalt.err (!%p76_p7)
}
  0x10   :  { %s107_s19 = smov 128   ;;  %s108_s20 = smov 8  }
  0x11   :  { %21 = dma.hbm_to_vmem [thread:$0]  %s158_s0, 256, %s16_s10, [#allocation4], %s107_s19, %s107_s19, %s108_s20  }
  0x12   :  { %102 = dma.done.wait [#allocation4], 256  }
  0x13   :  { %103 = vsyncadd [#allocation4], 4294967040  ;;  %v30_v0 = vstv %s159_s1  ;;  %v28_v1 = vld [vmem:[#allocation3] sm:$0xff]  ;;  %v29_v2 = vld [vmem:[#allocation3 + $0x8] sm:$0xff]  ;;  %s109_s25 = smov [#allocation6]  }
  0x14   :  { %s42_s26 = sshll.u32 %s109_s25, 4  ;;  %v31_v3 = vadd.f32 %v30_v0, %v28_v1  ;;  %v32_v4 = vadd.f32 %v30_v0, %v29_v2  ;;  %s43_s26 = int_to_ptr.vmem [resolvable:$true] %s42_s26 }
  0x15   :  { %s80_s27 = scalar_lea.vmem %s43_s26, 256  ;;  %p85_p9 = scmp.lt.s32.totalorder %s43_s26, %s43_s26 }
  0x16   :  { %v33_v5 = vsub.f32 %v31_v3, %v30_v0  ;;  %v34_v6 = vsub.f32 %v32_v4, %v30_v0  ;;  %p81_p8 = scmp.ne.s32.totalorder %s43_s26, %s80_s27  ;;  %p86_p10 = scmp.lt.s32.totalorder %s80_s27, %s80_s27 }
  0x18   :  { %35 = vst [vmem:[#allocation6] sm:$0xff] %v33_v5  ;;  %36 = vst [vmem:[#allocation6 + $0x8] sm:$0xff] %v34_v6  ;;  %p87_p11 = por %p86_p10, %p85_p9 }
  0x1a   :  { %p88_p12 = pnand %p87_p11, %p81_p8 }
  0x1c   :  { %91 = shalt.err (!%p88_p12)
}
  0x1d   :  { %s92_s28 = scalar_lea.hbm %s160_s2, 256 }
  0x1e   :  { %p93_p13 = scmp.ne.s32.totalorder %s160_s2, %s92_s28  ;;  %p96_p0 = scmp.lt.u32.totalorder %s92_s28, %s160_s2 }
  0x20   :  { %p98_p1 = pnand %p96_p0, %p93_p13 }
  0x22   :  { %101 = shalt.err (!%p98_p1)
}
  0x23   :  { %48 = dma.vmem_to_hbm [thread:$0]  %s43_s26, 256, %s160_s2, [#allocation5], %s107_s19, %s107_s19, %s108_s20  }
  0x24   :  { %104 = dma.done.wait [#allocation5], 256  }
  0x25   :  { %105 = vsyncadd [#allocation5], 4294967040 }
  0x26   :  { %52 = vsyncpa [#allocation4], 1 }
  0x27   :  { %53 = vsyncpa [#allocation5], 1 }

</bundles_post_ra>
